<compile_context>
chip_gen: v6e
topology: v6e:2x2x1
jax: 0.10.0
libtpu: 0.0.40
codegen_flags: <defaults>
</compile_context>

<pallas_src>
import functools

import jax
import jax.numpy as jnp
from jax import lax
from jax.experimental import pallas as pl
from jax.experimental.pallas import tpu as pltpu

BN_EPS = 1e-5


# -----------------------------------------------------------------------------
# Fused single-pass kernel.
# -----------------------------------------------------------------------------
def shrinkage_kernel(x_ref, w1t_ref, b1_ref, w2t_ref, b2_ref, a_ref, out_ref,
                     *, l_orig, l_chunk, n_chunks):
    b_tile, C, _ = x_ref.shape
    small = n_chunks <= 8

    # Pass A: signed mean over L, chunked, f32 accumulation (padded lanes are 0).
    def sum_body(c, acc):
        start = pl.multiple_of(c * l_chunk, l_chunk)
        xc = x_ref[:, :, pl.ds(start, l_chunk)]
        return acc + jnp.sum(xc.astype(jnp.float32), axis=-1)

    total = lax.fori_loop(0, n_chunks, sum_body,
                          jnp.zeros((b_tile, C), jnp.float32), unroll=small)
    average = total * (1.0 / l_orig)                                  # (b_tile, C)

    # Tiny MLP: 1x1 conv (eval-mode BN folded in) -> ReLU -> 1x1 conv -> Hardsigmoid.
    h = jnp.dot(average, w1t_ref[...], preferred_element_type=jnp.float32) + b1_ref[...]
    h = jnp.maximum(h, 0.0)
    h = jnp.dot(h, w2t_ref[...], preferred_element_type=jnp.float32) + b2_ref[...]
    s = jnp.clip(h * (1.0 / 6.0) + 0.5, 0.0, 1.0)                     # Hardsigmoid

    # Per-(batch, channel) threshold, f32 (a read from SMEM).  Hoist the reshape
    # out of the loop (broadcast_in_dim is not CSE'd by JAX).
    thr = (a_ref[0] * average * s)[:, :, None]                        # (b_tile, C, 1)

    # Pass B: soft-threshold with sign transfer, chunked over L so intermediates
    # stay small; l_chunk is a multiple of 128 -> lane-dense (unmasked) stores.
    def apply_body(c, carry):
        start = pl.multiple_of(c * l_chunk, l_chunk)
        xf = x_ref[:, :, pl.ds(start, l_chunk)].astype(jnp.float32)
        n_sub = jnp.maximum(jnp.abs(xf) - thr, 0.0)
        signed = jnp.where(xf < 0, -n_sub, n_sub)
        res = jnp.where(xf == 0, 0.0, signed)                         # torch.sign(0)==0
        out_ref[:, :, pl.ds(start, l_chunk)] = res.astype(out_ref.dtype)
        return carry

    lax.fori_loop(0, n_chunks, apply_body, 0, unroll=small)


# -----------------------------------------------------------------------------
# Two-pass fallback: pure-elementwise apply kernel (thresholds precomputed).
# -----------------------------------------------------------------------------
def shrinkage_apply_kernel(thr_ref, x_ref, out_ref):
    xf = x_ref[...].astype(jnp.float32)                               # (bt, C, lt)
    thr = thr_ref[...][:, :, None]                                    # (bt, C, 1) f32
    n_sub = jnp.maximum(jnp.abs(xf) - thr, 0.0)
    signed = jnp.where(xf < 0, -n_sub, n_sub)
    out_ref[...] = jnp.where(xf == 0, 0.0, signed).astype(out_ref.dtype)


def _vmem_budgets():
    """(block_budget_bytes, vmem_limit_bytes), sized to this generation's VMEM."""
    try:
        cap = int(pltpu.get_tpu_info().vmem_capacity_bytes)
    except Exception:
        cap = 64 * 1024 * 1024  # conservative fallback (v7x-sized)
    # Blocks (double-buffered x + out) ~40% of physical, scoped limit ~75%:
    #   v5e/v6e (128 MiB): ~51 / 96 MiB;   v7x (64 MiB): ~25 / 48 MiB.
    return int(cap * 0.40), int(cap * 0.75)


def _shrinkage_two_pass(x, x_pad, a_f, w1t_f, b1_f, w2t, b2_f, *,
                        l_orig, block_budget, vmem_limit):
    """Pass 1: (B, C) thresholds (plain XLA, tiny).  Pass 2: tiled Pallas apply."""
    # TODO(synk): pass 1 could itself be an L-tiled Pallas reduction kernel; the
    # MLP is tiny so plain XLA is fine (costs one extra HBM read of x overall).
    B, C, Lp = x_pad.shape
    average = jnp.mean(x.astype(jnp.float32), axis=-1)                # signed mean
    h = jnp.maximum(average @ w1t_f + b1_f, 0.0)
    h = h @ w2t + b2_f
    s = jnp.clip(h * (1.0 / 6.0) + 0.5, 0.0, 1.0)
    thr = (a_f[0] * average * s).astype(jnp.float32)                  # (B, C)

    elem = x.dtype.itemsize
    # Sublane-friendly batch tile (divisible by 8 or == B keeps the (8,128) rule
    # satisfied for the 2-D thresholds block).
    bt = B if B < 8 else 8
    # Apply kernel materializes block-sized temporaries: budget ~4 dbuf blocks
    # (input dtype) + ~4 f32 temporaries per element.
    bytes_per_lane = bt * C * (4 * elem + 4 * 4)
    lt = block_budget // max(1, bytes_per_lane)
    lt = min(Lp, max(128, (lt // 128) * 128))
    grid = (pl.cdiv(B, bt), pl.cdiv(Lp, lt))

    out = pl.pallas_call(
        shrinkage_apply_kernel,
        out_shape=jax.ShapeDtypeStruct((B, C, Lp), x.dtype),
        grid=grid,
        in_specs=[
            pl.BlockSpec((bt, C), lambda i, j: (i, 0)),               # thresholds
            pl.BlockSpec((bt, C, lt), lambda i, j: (i, 0, j)),        # x
        ],
        out_specs=pl.BlockSpec((bt, C, lt), lambda i, j: (i, 0, j)),
        compiler_params=pltpu.CompilerParams(
            dimension_semantics=("parallel", "parallel"),
            vmem_limit_bytes=vmem_limit,
        ),
        cost_estimate=pl.CostEstimate(
            flops=7 * B * C * Lp, transcendentals=0,
            bytes_accessed=2 * B * C * Lp * elem + 4 * B * C),
    )(thr, x_pad)
    return out if Lp == l_orig else out[:, :, :l_orig]


def shrinkage(x, a, w1, b1, gamma, beta, running_mean, running_var, w2, b2, *,
              b_tile=None, force_two_pass=False):
    """x: (B, C, L).  w1: (mip, C), w2: (C, mip) (1x1-conv weights, kernel dim
    squeezed).  a: scalar / shape-(1,) parameter.  BatchNorm params: eval mode."""
    B, C, L = x.shape
    mip = w1.shape[0]
    assert w1.shape == (mip, C) and w2.shape == (C, mip)

    # Fold eval-mode BatchNorm1d into the first 1x1 conv (outside the kernel).
    inv_std = (gamma / jnp.sqrt(running_var + BN_EPS)).astype(jnp.float32)   # (mip,)
    w1t_f = w1.T.astype(jnp.float32) * inv_std[None, :]                      # (C, mip)
    b1_f = ((b1 - running_mean) * inv_std + beta).astype(jnp.float32)        # (mip,)
    w2t = w2.T.astype(jnp.float32)                                           # (mip, C)
    b2_f = b2.astype(jnp.float32)
    a_f = jnp.asarray(a, jnp.float32).reshape(1)                             # SMEM scalar

    # Lane-dense last dim: pad L to a multiple of 128 (zeros don't perturb the
    # signed mean because the kernel divides by the original L).
    Lp = ((L + 127) // 128) * 128
    x_in = x if Lp == L else jnp.pad(x, ((0, 0), (0, 0), (0, Lp - L)))

    elem = x.dtype.itemsize
    block_budget, vmem_limit = _vmem_budgets()
    bytes_per_row = C * Lp * elem

    # In-kernel L chunk: largest multiple of 128 that divides Lp and is <= 512.
    m = Lp // 128
    l_chunk = next(128 * d for d in (4, 2, 1) if m % d == 0)
    n_chunks = Lp // l_chunk

    # Dispatch to the two-pass path when even a b_tile=1 slab (double-buffered
    # in + out) cannot fit the generation's block budget.
    if force_two_pass or 4 * bytes_per_row > block_budget:
        return _shrinkage_two_pass(x, x_in, a_f, w1t_f, b1_f, w2t, b2_f,
                                   l_orig=L, block_budget=block_budget,
                                   vmem_limit=vmem_limit)

    if b_tile is None:
        # 4 block-sized buffers (double-buffered in + out) plus the residual f32
        # chunk temporaries of the chunked epilogue (~3 chunks worth, per row).
        temp_rows = 3.0 * (4.0 / elem) * (l_chunk / Lp)
        cap = max(1, int(block_budget / ((4.0 + temp_rows) * bytes_per_row)))
        cap = min(cap, B)
        # Keep >= 2 grid steps so the batch axis can shard across v7x's two
        # TensorCores (costs only ~0.35us extra pipeline overhead on 1-TC chips).
        if B >= 2:
            cap = min(cap, pl.cdiv(B, 2))
        # Prefer a tile that divides B (no ragged tail doing padded work), unless
        # that would shrink the tile by more than 2x.
        b_tile = cap
        for cand in range(cap, 0, -1):
            if B % cand == 0:
                if 2 * cand >= cap:
                    b_tile = cand
                break
    grid = (pl.cdiv(B, b_tile),)
    # NOTE: if B % b_tile != 0, the last block's padded rows flow through the
    # mean/MLP as garbage but everything is per-row, so the garbage outputs are
    # simply masked on store -- no cross-row mixing.

    kernel = functools.partial(shrinkage_kernel, l_orig=L, l_chunk=l_chunk,
                               n_chunks=n_chunks)

    flops = 8 * B * C * L + 4 * B * C * mip
    bytes_accessed = 2 * B * C * Lp * elem + 4 * (int(w1t_f.size) + int(w2t.size) + mip + C + 1)

    out = pl.pallas_call(
        kernel,
        out_shape=jax.ShapeDtypeStruct((B, C, Lp), x.dtype),
        grid=grid,
        in_specs=[
            pl.BlockSpec((b_tile, C, Lp), lambda i: (i, 0, 0)),       # x (batch-tiled)
            pl.BlockSpec((C, mip), lambda i: (0, 0)),                 # folded W1^T
            pl.BlockSpec((1, mip), lambda i: (0, 0)),                 # folded b1
            pl.BlockSpec((mip, C), lambda i: (0, 0)),                 # W2^T
            pl.BlockSpec((1, C), lambda i: (0, 0)),                   # b2
            pl.BlockSpec(memory_space=pltpu.MemorySpace.SMEM),        # a (scalar, SMEM)
        ],
        out_specs=pl.BlockSpec((b_tile, C, Lp), lambda i: (i, 0, 0)),
        compiler_params=pltpu.CompilerParams(
            dimension_semantics=("parallel",),
            vmem_limit_bytes=vmem_limit,
        ),
        cost_estimate=pl.CostEstimate(
            flops=flops, transcendentals=0, bytes_accessed=bytes_accessed),
    )(x_in, w1t_f, b1_f.reshape(1, mip), w2t, b2_f.reshape(1, C), a_f)

    return out if Lp == L else out[:, :, :L]


def shrinkage_ref(x, a, w1, b1, gamma, beta, running_mean, running_var, w2, b2):
    """Pure-JAX reference mirroring the PyTorch forward (BN eval mode, gap_size=1)."""
    x = x.astype(jnp.float32)
    x_abs = jnp.abs(x)
    average = jnp.mean(x, axis=-1)                        # signed mean, (B, C)
    h = average @ w1.T + b1
    h = (h - running_mean) / jnp.sqrt(running_var + BN_EPS) * gamma + beta
    h = jnp.maximum(h, 0.0)
    h = h @ w2.T + b2
    s = jnp.clip(h / 6.0 + 0.5, 0.0, 1.0)                 # Hardsigmoid
    thr = (a.reshape(()) * average * s)[:, :, None]
    n_sub = jnp.maximum(x_abs - thr, 0.0)
    return jnp.sign(x) * n_sub


if __name__ == "__main__":
    # inp = oup = 16, reduction = 4  ->  mip = max(8, 16 // 4) = 8;  gap_size = 1.
    B, C, L = 4, 16, 128
    mip = max(8, C // 4)

    key = jax.random.PRNGKey(0)
    kx, kw1, kb1, kw2, kb2, kg, kbt, km, kv = jax.random.split(key, 9)

    x = jax.random.normal(kx, (B, C, L), dtype=jnp.float32)

    a = jnp.array([0.4], dtype=jnp.float32)
    w1 = jax.random.normal(kw1, (mip, C), dtype=jnp.float32) * 0.2      # Conv1d(inp->mip, k=1)
    b1 = jax.random.normal(kb1, (mip,), dtype=jnp.float32) * 0.1
    w2 = jax.random.normal(kw2, (C, mip), dtype=jnp.float32) * 0.2      # Conv1d(mip->oup, k=1)
    b2 = jax.random.normal(kb2, (C,), dtype=jnp.float32) * 0.1
    gamma = 1.0 + 0.1 * jax.random.normal(kg, (mip,), dtype=jnp.float32)
    beta = 0.1 * jax.random.normal(kbt, (mip,), dtype=jnp.float32)
    running_mean = 0.1 * jax.random.normal(km, (mip,), dtype=jnp.float32)
    running_var = 1.0 + 0.1 * jnp.abs(jax.random.normal(kv, (mip,), dtype=jnp.float32))

    args = (x, a, w1, b1, gamma, beta, running_mean, running_var, w2, b2)
    ref = shrinkage_ref(*args)

    # Fused single-pass path, forced 2-step grid to exercise the pipeline.
    out = jax.block_until_ready(shrinkage(*args, b_tile=2))
    assert out.shape == (B, C, L)
    assert jnp.allclose(out, ref, atol=1e-5, rtol=1e-5), "single-pass mismatch"

    # Default (heuristic) tiling.
    out_auto = jax.block_until_ready(shrinkage(*args))
    assert jnp.allclose(out_auto, ref, atol=1e-5, rtol=1e-5), "auto-tile mismatch"

    # Two-pass fallback (XLA thresholds + tiled Pallas apply).
    out_tp = jax.block_until_ready(shrinkage(*args, force_two_pass=True))
    assert jnp.allclose(out_tp, ref, atol=1e-5, rtol=1e-5), "two-pass mismatch"

    # Non-multiple-of-128 L exercises the lane-padding path.
    x2 = jax.random.normal(jax.random.PRNGKey(1), (B, C, 96), dtype=jnp.float32)
    args2 = (x2,) + args[1:]
    out2 = jax.block_until_ready(shrinkage(*args2))
    assert out2.shape == (B, C, 96)
    assert jnp.allclose(out2, shrinkage_ref(*args2), atol=1e-5, rtol=1e-5), "padded-L mismatch"

    print("KERNEL_OK")
</pallas_src>

<mosaic_0001>
module attributes {stable_mosaic.version = 11 : i64} {
  func.func @shrinkage_kernel(%arg0: i32, %arg1: memref<2x16x128xf32, #tpu.memory_space<vmem>>, %arg2: memref<16x8xf32, #tpu.memory_space<vmem>>, %arg3: memref<1x8xf32, #tpu.memory_space<vmem>>, %arg4: memref<8x16xf32, #tpu.memory_space<vmem>>, %arg5: memref<1x16xf32, #tpu.memory_space<vmem>>, %arg6: memref<1xf32, #tpu.memory_space<smem>>, %arg7: memref<2x16x128xf32, #tpu.memory_space<vmem>>) attributes {dimension_semantics = [#tpu.dimension_semantics<parallel>], iteration_bounds = array<i64: 2>, scalar_prefetch = 0 : i64, scratch_operands = 0 : i64, tpu.core_type = #tpu.core_type<tc>, window_params = [{transform_indices = @transform_0, window_bounds = array<i64: 2, 16, 128>}, {pipeline_mode = #tpu.pipeline_mode<synchronous>, transform_indices = @transform_1, window_bounds = array<i64: 16, 8>}, {pipeline_mode = #tpu.pipeline_mode<synchronous>, transform_indices = @transform_2, window_bounds = array<i64: 1, 8>}, {pipeline_mode = #tpu.pipeline_mode<synchronous>, transform_indices = @transform_3, window_bounds = array<i64: 8, 16>}, {pipeline_mode = #tpu.pipeline_mode<synchronous>, transform_indices = @transform_4, window_bounds = array<i64: 1, 16>}, {transform_indices = @transform_5, window_bounds = array<i64: 1>}, {transform_indices = @transform_6, window_bounds = array<i64: 2, 16, 128>}]} {
    %cst = arith.constant 0.000000e+00 : f32
    %0 = vector.broadcast %cst : f32 to vector<2x16xf32>
    %c0_i32 = arith.constant 0 : i32
    %c128_i32 = arith.constant 128 : i32
    %1 = arith.muli %c0_i32, %c128_i32 : i32
    %2 = tpu.assume_multiple %1, 128 : i32
    %c0 = arith.constant 0 : index
    %c0_0 = arith.constant 0 : index
    %3 = arith.index_cast %2 : i32 to index
    %4 = vector.load %arg1[%c0, %c0_0, %3] : memref<2x16x128xf32, #tpu.memory_space<vmem>>, vector<2x16x128xf32>
    %cst_1 = arith.constant dense<0.000000e+00> : vector<2x16xf32>
    %5 = vector.multi_reduction <add>, %4, %cst_1 [2] : vector<2x16x128xf32> to vector<2x16xf32>
    %6 = arith.addf %0, %5 : vector<2x16xf32>
    %c1_i32 = arith.constant 1 : i32
    %cst_2 = arith.constant 7.812500e-03 : f32
    %7 = vector.broadcast %cst_2 : f32 to vector<2x16xf32>
    %8 = arith.mulf %6, %7 : vector<2x16xf32>
    %c0_3 = arith.constant 0 : index
    %c0_4 = arith.constant 0 : index
    %9 = vector.load %arg2[%c0_3, %c0_4] : memref<16x8xf32, #tpu.memory_space<vmem>>, vector<16x8xf32>
    %cst_5 = arith.constant dense<0.000000e+00> : vector<2x8xf32>
    %10 = tpu.matmul %8, %9, %cst_5 {dimension_numbers = #tpu.dot_dimension_numbers<[1], [0], [0], [1], [0, 0, 1, 1], [], []>} : vector<2x16xf32>, vector<16x8xf32>, vector<2x8xf32> -> vector<2x8xf32>
    %c0_6 = arith.constant 0 : index
    %c0_7 = arith.constant 0 : index
    %11 = vector.load %arg3[%c0_6, %c0_7] : memref<1x8xf32, #tpu.memory_space<vmem>>, vector<1x8xf32>
    %12 = vector.broadcast %11 : vector<1x8xf32> to vector<2x8xf32>
    %13 = arith.addf %10, %12 : vector<2x8xf32>
    %cst_8 = arith.constant 0.000000e+00 : f32
    %14 = vector.broadcast %cst_8 : f32 to vector<2x8xf32>
    %15 = arith.maximumf %13, %14 : vector<2x8xf32>
    %c0_9 = arith.constant 0 : index
    %c0_10 = arith.constant 0 : index
    %16 = vector.load %arg4[%c0_9, %c0_10] : memref<8x16xf32, #tpu.memory_space<vmem>>, vector<8x16xf32>
    %cst_11 = arith.constant dense<0.000000e+00> : vector<2x16xf32>
    %17 = tpu.matmul %15, %16, %cst_11 {dimension_numbers = #tpu.dot_dimension_numbers<[1], [0], [0], [1], [0, 0, 1, 1], [], []>} : vector<2x8xf32>, vector<8x16xf32>, vector<2x16xf32> -> vector<2x16xf32>
    %c0_12 = arith.constant 0 : index
    %c0_13 = arith.constant 0 : index
    %18 = vector.load %arg5[%c0_12, %c0_13] : memref<1x16xf32, #tpu.memory_space<vmem>>, vector<1x16xf32>
    %19 = vector.broadcast %18 : vector<1x16xf32> to vector<2x16xf32>
    %20 = arith.addf %17, %19 : vector<2x16xf32>
    %cst_14 = arith.constant 0.166666672 : f32
    %21 = vector.broadcast %cst_14 : f32 to vector<2x16xf32>
    %22 = arith.mulf %20, %21 : vector<2x16xf32>
    %cst_15 = arith.constant 5.000000e-01 : f32
    %23 = vector.broadcast %cst_15 : f32 to vector<2x16xf32>
    %24 = arith.addf %22, %23 : vector<2x16xf32>
    %cst_16 = arith.constant 0.000000e+00 : f32
    %cst_17 = arith.constant 1.000000e+00 : f32
    %25 = vector.broadcast %cst_16 : f32 to vector<2x16xf32>
    %26 = arith.maximumf %25, %24 : vector<2x16xf32>
    %27 = vector.broadcast %cst_17 : f32 to vector<2x16xf32>
    %28 = arith.minimumf %27, %26 : vector<2x16xf32>
    %c0_18 = arith.constant 0 : index
    %29 = memref.load %arg6[%c0_18] : memref<1xf32, #tpu.memory_space<smem>>
    %30 = vector.broadcast %29 : f32 to vector<2x16xf32>
    %31 = arith.mulf %30, %8 : vector<2x16xf32>
    %32 = arith.mulf %31, %28 : vector<2x16xf32>
    %33 = vector.shape_cast %32 : vector<2x16xf32> to vector<2x16x1xf32>
    %c0_i32_19 = arith.constant 0 : i32
    %c128_i32_20 = arith.constant 128 : i32
    %34 = arith.muli %c0_i32_19, %c128_i32_20 : i32
    %35 = tpu.assume_multiple %34, 128 : i32
    %c0_21 = arith.constant 0 : index
    %c0_22 = arith.constant 0 : index
    %36 = arith.index_cast %35 : i32 to index
    %37 = vector.load %arg1[%c0_21, %c0_22, %36] : memref<2x16x128xf32, #tpu.memory_space<vmem>>, vector<2x16x128xf32>
    %38 = math.absf %37 : vector<2x16x128xf32>
    %39 = vector.broadcast %33 : vector<2x16x1xf32> to vector<2x16x128xf32>
    %40 = arith.subf %38, %39 : vector<2x16x128xf32>
    %cst_23 = arith.constant 0.000000e+00 : f32
    %41 = vector.broadcast %cst_23 : f32 to vector<2x16x128xf32>
    %42 = arith.maximumf %40, %41 : vector<2x16x128xf32>
    %cst_24 = arith.constant 0.000000e+00 : f32
    %43 = vector.broadcast %cst_24 : f32 to vector<2x16x128xf32>
    %44 = arith.cmpf olt, %37, %43 : vector<2x16x128xf32>
    %cst_25 = arith.constant 0.000000e+00 : f32
    %45 = vector.broadcast %cst_25 : f32 to vector<2x16x128xf32>
    %46 = arith.subf %45, %42 : vector<2x16x128xf32>
    %47 = arith.select %44, %46, %42 : vector<2x16x128xi1>, vector<2x16x128xf32>
    %cst_26 = arith.constant 0.000000e+00 : f32
    %48 = vector.broadcast %cst_26 : f32 to vector<2x16x128xf32>
    %49 = arith.cmpf oeq, %37, %48 : vector<2x16x128xf32>
    %cst_27 = arith.constant 0.000000e+00 : f32
    %50 = vector.broadcast %cst_27 : f32 to vector<2x16x128xf32>
    %51 = arith.select %49, %50, %47 : vector<2x16x128xi1>, vector<2x16x128xf32>
    %c0_28 = arith.constant 0 : index
    %c0_29 = arith.constant 0 : index
    %52 = arith.index_cast %35 : i32 to index
    %53 = vector.load %arg7[%c0_28, %c0_29, %52] : memref<2x16x128xf32, #tpu.memory_space<vmem>>, vector<2x16x128xf32>
    tpu.vector_store %arg7[%c0_28, %c0_29, %52], %51 {strides = array<i32>} : memref<2x16x128xf32, #tpu.memory_space<vmem>>, vector<2x16x128xf32>,
    %c1_i32_30 = arith.constant 1 : i32
    return
  }
  func.func @transform_0(%arg0: i32) -> (i32, i32, i32) {
    %c0_i32 = arith.constant 0 : i32
    %c0_i32_0 = arith.constant 0 : i32
    %c0_i32_1 = arith.constant 0 : i32
    return %arg0, %c0_i32, %c0_i32_0 : i32, i32, i32
  }
  func.func @transform_1(%arg0: i32) -> (i32, i32) {
    %c0_i32 = arith.constant 0 : i32
    %c0_i32_0 = arith.constant 0 : i32
    %c0_i32_1 = arith.constant 0 : i32
    return %c0_i32, %c0_i32_0 : i32, i32
  }
  func.func @transform_2(%arg0: i32) -> (i32, i32) {
    %c0_i32 = arith.constant 0 : i32
    %c0_i32_0 = arith.constant 0 : i32
    %c0_i32_1 = arith.constant 0 : i32
    return %c0_i32, %c0_i32_0 : i32, i32
  }
  func.func @transform_3(%arg0: i32) -> (i32, i32) {
    %c0_i32 = arith.constant 0 : i32
    %c0_i32_0 = arith.constant 0 : i32
    %c0_i32_1 = arith.constant 0 : i32
    return %c0_i32, %c0_i32_0 : i32, i32
  }
  func.func @transform_4(%arg0: i32) -> (i32, i32) {
    %c0_i32 = arith.constant 0 : i32
    %c0_i32_0 = arith.constant 0 : i32
    %c0_i32_1 = arith.constant 0 : i32
    return %c0_i32, %c0_i32_0 : i32, i32
  }
  func.func @transform_5(%arg0: i32) -> i32 {
    %c0_i32 = arith.constant 0 : i32
    %c0_i32_0 = arith.constant 0 : i32
    return %c0_i32 : i32
  }
  func.func @transform_6(%arg0: i32) -> (i32, i32, i32) {
    %c0_i32 = arith.constant 0 : i32
    %c0_i32_0 = arith.constant 0 : i32
    %c0_i32_1 = arith.constant 0 : i32
    return %arg0, %c0_i32, %c0_i32_0 : i32, i32, i32
  }
}

</mosaic_0001>

<bundles_post_ra>
// kernel: tpu_custom_call.1
= control target key start
LH: loop header
LB: loop body
LE: loop exit
PB: predicated region body
PF: predicated region fallthrough
CT: control target
= control target key end

     0   :  { %s1106_s0 = inlined_call_operand.hbm [shape: f32[4,16,128], index: 0, kind: input, shape index: {}]   ;;  %s1107_s1 = inlined_call_operand.vmem [shape: f32[16,8], index: 1, kind: input, shape index: {}]   ;;  %s1108_s2 = inlined_call_operand.vmem [shape: f32[1,8], index: 2, kind: input, shape index: {}]   ;;  %s1109_s3 = inlined_call_operand.vmem [shape: f32[8,16], index: 3, kind: input, shape index: {}]   ;;  %s1110_s4 = inlined_call_operand.vmem [shape: f32[1,16], index: 4, kind: input, shape index: {}]   ;;  %s1111_s5 = inlined_call_operand.<no memory space> [shape: f32[1], index: 5, kind: input, shape index: {}]   ;;  %s1112_s6 = inlined_call_operand.hbm [shape: f32[4,16,128], index: 6, kind: output, shape index: {}]  }
   0x1   :  { %11 = sst [smem:[#allocation2]] %s1111_s5 }
   0x2   :  { %12 = vsyncpa [#allocation4], 0 }
   0x3   :  { %14 = vsyncpa [#allocation4 + $0x1], 0 }
   0x4   :  { %15 = vsyncpa [#allocation5], 0 }
   0x5   :  { %17 = vsyncpa [#allocation5 + $0x1], 0  ;;  %s909_s23 = smov 0   ;;  %s911_s24 = smov 0  }
   0x6   :  { %s913_s25 = smov 0   ;;  %s915_s26 = smov 0  }
   0x7 LB: > { %s930_s5 = sadd.s32 4294967295, %s860_s26   ;;  %s672_s27 = sadd.s32 4294967294, %s860_s26   ;;  %s860_s26 = sphi %s915_s26, %s1127_s26   ;;  %s856_s25 = sphi %s913_s25, %s1126_s25   ;;  %s852_s24 = sphi %s911_s24, %s1125_s24   ;;  %s848_s23 = sphi %s909_s23, %s1124_s23  }
   0x8   : > { %s934_s28 = sadd.s32 1, %s860_s26   ;;  %s30_s29 = sadd.s32 1, %s856_s25 }
   0x9   : > { %s27_s30 = ssub.s32 %s860_s26, %s934_s28  ;;  %p37_p0 = scmp.ne.s32.totalorder %s856_s25, %s852_s24 }
   0xa   : > { %p28_p1 = scmp.eq.s32.totalorder %s27_s30, 0  ;;  %p38_p2 = scmp.eq.s32.totalorder %s860_s26, 0 }
   0xb   : > { %p43_p3 = scmp.ne.s32.totalorder %s852_s24, %s848_s23  ;;  %p44_p4 = scmp.eq.s32.totalorder %s930_s5, 0 }
   0xc   : > { %s946_s7 = scalar_select %p28_p1, %s856_s25, %s30_s29  }
   0xd   : > { %p948_p5 = por %p38_p2, %p37_p0  ;;  %p952_p6 = por %p44_p4, %p43_p3 }
   0xe   : > { %p172_p7 = scmp.eq.s32.totalorder %s930_s5, 1  ;;  %p178_p8 = scmp.eq.s32.totalorder %s672_s27, 1 }
   0xf   : > { %s1116_s9 = scalar_select %p952_p6, 1, 0 }
  0x10   : > { %p725_p10 = scmp.lt.s32.totalorder %s860_s26, 2  ;;  %p959_p11 = por %p172_p7, %p37_p0 }
  0x11   : > { %p963_p12 = por %p178_p8, %p43_p3  ;;  %s213_s12 = sand.u32 1, %s856_s25  }
  0x12   : > { %s1117_s10 = scalar_select %p959_p11, 1, 0 }
  0x13   : > { %s1118_s11 = scalar_select %p963_p12, 1, 0 }
  0x14   : > { %s693_s13 = sshll.u32 %s860_s26, 9  ;;  %s675_s14 = sshll.u32 %s213_s12, 5 }
  0x15   : > { %s972_s17 = scalar_lea.hbm %s1106_s0, %s693_s13  ;;  %s217_s18 = scalar_lea.vmem [#allocation3], %s675_s14 }
  0x16   : > { %s225_s19 = sshll.u32 %s217_s18, 4  ;;  %p976_p13 = pnand %p725_p10, %p948_p5  ;;  %s980_s19 = int_to_ptr.vmem [resolvable:$true] %s225_s19 }
  0x17   : > { %s982_s21 = scalar_lea.sflag [#allocation4], %s213_s12  ;;  %s768_s22 = scalar_lea.hbm %s972_s17, 512 }
  0x18   : > { %p769_p0 = scmp.ne.s32.totalorder %s972_s17, %s768_s22  ;;  %p770_p1 = pneg %p976_p13 }
  0x19   : > { %s773_s30 = scalar_lea.hbm %s1106_s0, 1024  ;;  %p774_p4 = scmp.lt.s32.totalorder %s972_s17, %s1106_s0 }
  0x1a   : > { %p771_p2 = pnand %p770_p1, %p769_p0  ;;  %p775_p5 = scmp.lt.s32.totalorder %s773_s30, %s768_s22 }
  0x1c   : > { %p772_p3 = pneg %p771_p2  ;;  %p776_p7 = por %p775_p5, %p774_p4 }
  0x1e   : > { %p777_p8 = pnand %p776_p7, %p772_p3 }
  0x20   : > { %780 = shalt.err (!%p777_p8)
}
  0x21   : > { %s781_s12 = scalar_lea.vmem %s980_s19, 512  ;;  %s862_s14 = smov [#allocation3]  }
  0x22   : > { %p782_p10 = scmp.ne.s32.totalorder %s980_s19, %s781_s12  ;;  %s786_s15 = sshll.u32 %s862_s14, 4  ;;  %s787_s15 = int_to_ptr.vmem [resolvable:$false] %s786_s15 }
  0x23   : > { %s788_s16 = scalar_lea.vmem %s787_s15, 1024  ;;  %p789_p2 = scmp.lt.s32.totalorder %s980_s19, %s787_s15 }
  0x24   : > { %p784_p9 = pnand %p782_p10, %p770_p1  ;;  %p790_p12 = scmp.lt.s32.totalorder %s788_s16, %s781_s12 }
  0x26   : > { %p785_p0 = pneg %p784_p9  ;;  %p791_p11 = por %p790_p12, %p789_p2 }
  0x28   : > { %p792_p6 = pnand %p791_p11, %p785_p0 }
  0x2a   : > { %795 = shalt.err (!%p792_p6)
}
  0x2b   : > { %s863_s18 = smov 128   ;;  %s864_s22 = smov 8  }
  0x2c   : > { %720 = dma.hbm_to_vmem [thread:$0]  (!%p976_p13), %s972_s17, 512, %s980_s19, %s982_s21, %s863_s18, %s863_s18, %s864_s22  }
  0x2d   : > { %p679_p9 = scmp.ge.s32.totalorder %s860_s26, 1  ;;  %p233_p1 = scmp.lt.s32.totalorder %s860_s26, 3 }
  0x2f   : > { %p234_p3 = pnand %p679_p9, %p233_p1 }
  0x30   : > { %s1006_s27 = sand.u32 (!%p234_p3), 1, %s852_s24   ;;  %p1120_p6 = scmp.ne.s32.totalorder (!%p234_p3), %s1116_s9, 0 }
  0x31   : > { %237 = sbr.rel (%p234_p3) target bundleno = 877 (0x36d), region = 44  ;;  %s680_s29 = sshll.u32 (!%p234_p3), %s1006_s27, 5 }
  0x32   : > { %s240_s30 = scalar_lea.sflag (!%p234_p3), [#allocation4], %s1006_s27  ;;  %s243_s8 = scalar_lea.vmem (!%p234_p3), [#allocation3], %s680_s29 }
  0x36   : > { %839 = dma.done.wait (%p1120_p6), %s240_s30, 512  }
  0x37   : > { %841 = vsyncadd (%p1120_p6), %s240_s30, 4294966784  ;;  %v1016_v0 = vld [vmem:[%s243_s8 + $0x10] sm:$0xff]  ;;  %v1018_v1 = vld [vmem:[%s243_s8] sm:$0xff]  ;;  %v865_v4 = vmov 0.0   ;;  %vm866_vm0 = vmmov 0   ;;  %v307_v7 = vlaneseq  ;;  %vm318_vm1 = vcmask 130112  }
  0x38   : > { %282 = vadd.xlane.f32.xlu1 %v1016_v0  ;;  %278 = vadd.xlane.f32.xlu0 %v1018_v1  ;;  %v1022_v2 = vld [vmem:[%s243_s8 + $0x18] sm:$0xff]  ;;  %v1024_v3 = vld [vmem:[%s243_s8 + $0x8] sm:$0xff]  ;;  %v294_v6 = vld [vmem:[%s1107_s1] sm:$0xff]  ;;  %vm329_vm2 = vcmask 1041409   ;;  %vm331_vm3 = vcmask 130048   ;;  %vm413_vm4 = vcmask 64512  }
  0x39   : > { %701 = vmatprep.subr.mxu0 %v865_v4  ;;  %v295_v5 = vld [vmem:[%s1107_s1 + $0x8] sm:$0xff]  ;;  %708 = vmatprep.subr.mxu1 %v865_v4  ;;  %v308_v8 = vand.u32 127, %v307_v7  ;;  %v310_v9 = vshrl.u32 %v307_v7, 7  ;;  %v405_v28 = vld [vmem:[%s1109_s3] sm:$0xff]  ;;  %v867_v37 = vmov 0   ;;  %s491_s18 = sld [smem:[#allocation2]] }
  0x3a   : > { %702 = vmatpush3.msra.mxu0 %v295_v5  ;;  %705 = vmatprep.mubr.msk.f32.mxu0 %vm866_vm0, %v865_v4  ;;  %v682_v29 = vld [vmem:[%s1108_s2] ss:$0 sm:$0xff]  ;;  %v529_v60 = vand.u32 2147483647, %v1024_v3  ;;  %v528_v61 = vand.u32 2147483647, %v1018_v1 }
  0x3b   : > { %703 = vmatprep.subr.mxu0 %v865_v4  ;;  %710 = vmatprep.mubr.msk.f32.mxu1 %vm866_vm0, %v865_v4  ;;  %v313_v10 = vadd.s32 4294967288, %v308_v8  ;;  %v311_v13 = vsub.s32 %v308_v8, %v310_v9  ;;  %v684_v34 = vld [vmem:[%s1110_s4] ss:$0 sm:$0xff]  ;;  %v500_v42 = vsub.s32 0, %v310_v9  ;;  %v511_v45 = vsub.s32 1, %v310_v9  ;;  %s271_s22 = scalar_lea.vmem [#allocation6], %s680_s29 }
  0x3c   : > { %284 = vadd.xlane.f32.xlu1 %v1022_v2  ;;  %280 = vadd.xlane.f32.xlu0 %v1024_v3  ;;  %vm560_vm5 = vcmp.lt.f32.partialorder %v1018_v1, 0.0  ;;  %vm561_vm6 = vcmp.lt.f32.partialorder %v1024_v3, 0.0  ;;  %vm573_vm7 = vcmp.eq.f32.partialorder %v1024_v3, 0.0  ;;  %vm572_vm8 = vcmp.eq.f32.partialorder %v1018_v1, 0.0  ;;  %s599_s30 = sshll.u32 %s271_s22, 4  ;;  %s695_s8 = sshll.u32 %s930_s5, 9  ;;  %s1057_s30 = int_to_ptr.vmem [resolvable:$true] %s599_s30 }
  0x3d   : > { %704 = vmatpush3.msra.mxu0 %v294_v6  ;;  %v316_v16 = vsub.s32 %v313_v10, %v310_v9  ;;  %709 = vmatpush3.msra.mxu1 %v405_v28  ;;  %v530_v6 = vand.u32 2147483647, %v1016_v0  ;;  %vm562_vm9 = vcmp.lt.f32.partialorder %v1016_v0, 0.0  ;;  %vm574_vm10 = vcmp.eq.f32.partialorder %v1016_v0, 0.0  ;;  %s1063_s17 = scalar_lea.hbm %s1112_s6, %s695_s8  ;;  %s585_s5 = scalar_lea.sflag [#allocation5], %s1006_s27 }
  0x3e   : > { %767 = vset.pattern.permute.xlu1 %v867_v37  ;;  %766 = vset.pattern.permute.xlu0 %v867_v37  ;;  %vm563_vm11 = vcmp.lt.f32.partialorder %v1022_v2, 0.0  ;;  %vm575_vm12 = vcmp.eq.f32.partialorder %v1022_v2, 0.0  ;;  %s796_s19 = scalar_lea.vmem %s1057_s30, 512  ;;  %p1121_p12 = scmp.ne.s32.totalorder %s1117_s10, 0 }
  0x3f   : > { %v492_v47 = vstv %s491_s18  ;;  %p797_p11 = scmp.ne.s32.totalorder %s1057_s30, %s796_s19  ;;  %s868_s20 = smov [#allocation6]  }
  0x40   : > { %s800_s21 = sshll.u32 %s868_s20, 4  ;;  %s801_s21 = int_to_ptr.vmem [resolvable:$false] %s800_s21 }
  0x41   : > { %p798_p13 = pnand %p797_p11, %p1121_p12  ;;  %s802_s13 = scalar_lea.vmem %s801_s21, 1024 }
  0x42   : > { %p803_p5 = scmp.lt.s32.totalorder %s1057_s30, %s801_s21  ;;  %p804_p7 = scmp.lt.s32.totalorder %s802_s13, %s796_s19 }
  0x43   : > { %p799_p4 = pneg %p798_p13 }
  0x44   : > { %p805_p8 = por %p804_p7, %p803_p5 }
  0x46   : > { %p806_p10 = pnand %p805_p8, %p799_p4 }
  0xc1   : > { %v283_v11 = vpop.xlane.xlu1 %282  ;;  %v279_v12 = vpop.xlane.xlu0 %278 }
  0xc2   : > { %v292_v14 = vmul.f32 0.0078125, %v283_v11  ;;  %v290_v15 = vmul.f32 0.0078125, %v279_v12 }
  0xc4   : > { %v323_v21 = vrot.slane %v292_v14, %v311_v13  ;;  %v312_v22 = vrot.slane %v290_v15, %v311_v13  ;;  %v493_v49 = vmul.f32 %v492_v47, %v290_v15  ;;  %v495_v54 = vmul.f32 %v492_v47, %v292_v14 }
  0xc5   : > { %v285_v17 = vpop.xlane.xlu1 %284  ;;  %v281_v18 = vpop.xlane.xlu0 %280  ;;  %v531_v13 = vand.u32 2147483647, %v1022_v2 }
  0xc6   : > { %v293_v19 = vmul.f32 0.0078125, %v285_v17  ;;  %v291_v20 = vmul.f32 0.0078125, %v281_v18 }
  0xc8   : > { %v327_v23 = vrot.slane %v293_v19, %v316_v16  ;;  %v317_v24 = vrot.slane %v291_v20, %v316_v16  ;;  %v494_v48 = vmul.f32 %v492_v47, %v291_v20  ;;  %v496_v57 = vmul.f32 %v492_v47, %v293_v19 }
  0xca   : > { %v319_v25 = vsel %vm318_vm1, %v317_v24, %v312_v22  ;;  %v328_v26 = vsel %vm318_vm1, %v327_v23, %v323_v21 }
  0xcb   : > { %v330_v27 = vsel %vm329_vm2, %v328_v26, %v319_v25 }
  0xcc   : > { %706 = vmatmul.mubr.msk.f32.vlgmr.msra.gmra.mxu0 %vm331_vm3, %v330_v27 }
 0x18c   : > { %v400_v30 = vpop.f32.mrf.mxu0 }
 0x18d   : > { %v401_v31 = vadd.f32 %v682_v29, %v400_v30 }
 0x18e   : > { %v707_v32 = vpop.f32.mrf.mxu0 }
 0x18f   : > { %v404_v33 = vmax.f32 %v401_v31, 0.0 }
 0x191   : > { %711 = vmatmul.mubr.msk.f32.vlgmr.msra.gmra.mxu1 %vm413_vm4, %v404_v33 }
 0x251   : > { %v483_v35 = vpop.f32.mrf.mxu1 }
 0x252   : > { %v484_v36 = vadd.f32 %v684_v34, %v483_v35 }
 0x253   : > { %v712_v38 = vpop.f32.mrf.mxu1 }
 0x254   : > { %v487_v39 = vmul.f32 0.16666667, %v484_v36 }
 0x256   : > { %v488_v40 = vadd.f32 0.5, %v487_v39 }
 0x258   : > { %v489_v41 = vmax.f32 %v488_v40, 0.0 }
 0x25a   : > { %v490_v43 = vmin.f32 %v489_v41, 1.0 }
 0x25c   : > { %v501_v44 = vrot.slane %v490_v43, %v500_v42  ;;  %v512_v46 = vrot.slane %v490_v43, %v511_v45 }
 0x25e   : > { %507 = vbcast.lane.b32.xlu1 %v501_v44, 264  ;;  %503 = vbcast.lane.b32.xlu0 %v501_v44, 256 }
 0x262   : > { %514 = vbcast.lane.b32.xlu1 %v512_v46, 256 }
 0x266   : > { %518 = vbcast.lane.b32.xlu1 %v512_v46, 264 }
 0x2d0   : > { %v508_v50 = vpop.permute.xlu1 %507  ;;  %v504_v51 = vpop.permute.xlu0 %503 }
 0x2d1   : > { %v525_v52 = vmul.f32 %v508_v50, %v494_v48  ;;  %v524_v53 = vmul.f32 %v504_v51, %v493_v49 }
 0x2d3   : > { %539 = vperm.xlu1 %767, %v525_v52   ;;  %534 = vperm.xlu0 %766, %v524_v53  }
 0x2d4   : > { %v515_v55 = vpop.permute.xlu1 %514 }
 0x2d5   : > { %v526_v56 = vmul.f32 %v515_v55, %v495_v54 }
 0x2d7   : > { %544 = vperm.xlu1 %767, %v526_v56  }
 0x2d8   : > { %v519_v58 = vpop.permute.xlu1 %518 }
 0x2d9   : > { %v527_v59 = vmul.f32 %v519_v58, %v496_v57 }
 0x2db   : > { %549 = vperm.xlu0 %766, %v527_v59  }
 0x34e   : > { %v540_v62 = vpop.permute.xlu1 %539  ;;  %v535_v63 = vpop.permute.xlu0 %534 }
 0x34f   : > { %v553_v4 = vsub.f32 %v529_v60, %v540_v62  ;;  %v552_v5 = vsub.f32 %v528_v61, %v535_v63 }
 0x351   : > { %v557_v7 = vmax.f32 %v553_v4, 0.0  ;;  %v556_v8 = vmax.f32 %v552_v5, 0.0 }
 0x352   : > { %v545_v9 = vpop.permute.xlu1 %544 }
 0x353   : > { %v565_v10 = vsub.f32 0.0, %v557_v7  ;;  %v564_v11 = vsub.f32 0.0, %v556_v8  ;;  %v554_v12 = vsub.f32 %v530_v6, %v545_v9 }
 0x355   : > { %v569_v14 = vsel %vm561_vm6, %v565_v10, %v557_v7  ;;  %v568_v15 = vsel %vm560_vm5, %v564_v11, %v556_v8  ;;  %v558_v16 = vmax.f32 %v554_v12, 0.0 }
 0x356   : > { %v577_v17 = vsel %vm573_vm7, 0.0, %v569_v14  ;;  %v576_v18 = vsel %vm572_vm8, 0.0, %v568_v15  ;;  %v550_v19 = vpop.permute.xlu0 %549 }
 0x357   : > { %581 = vst [vmem:[%s271_s22 + $0x8] sm:$0xff] %v577_v17  ;;  %580 = vst [vmem:[%s271_s22] sm:$0xff] %v576_v18  ;;  %v566_v1 = vsub.f32 0.0, %v558_v16  ;;  %v555_v3 = vsub.f32 %v531_v13, %v550_v19 }
 0x359   : > { %v570_v20 = vsel %vm562_vm9, %v566_v1, %v558_v16  ;;  %v559_v21 = vmax.f32 %v555_v3, 0.0 }
 0x35a   : > { %v578_v22 = vsel %vm574_vm10, 0.0, %v570_v20 }
 0x35b   : > { %582 = vst [vmem:[%s271_s22 + $0x10] sm:$0xff] %v578_v22  ;;  %v567_v0 = vsub.f32 0.0, %v559_v21 }
 0x35d   : > { %v571_v23 = vsel %vm563_vm11, %v567_v0, %v559_v21 }
 0x35e   : > { %v579_v24 = vsel %vm575_vm12, 0.0, %v571_v23 }
 0x35f   : > { %583 = vst [vmem:[%s271_s22 + $0x18] sm:$0xff] %v579_v24 }
 0x360   : > { %809 = shalt.err (!%p806_p10)
}
 0x361   : > { %s810_s12 = scalar_lea.hbm %s1063_s17, 512  ;;  %s814_s16 = scalar_lea.hbm %s1112_s6, 1024 }
 0x362   : > { %p811_p0 = scmp.ne.s32.totalorder %s1063_s17, %s810_s12  ;;  %p815_p1 = scmp.lt.s32.totalorder %s1063_s17, %s1112_s6 }
 0x363   : > { %p816_p3 = scmp.lt.s32.totalorder %s814_s16, %s810_s12 }
 0x364   : > { %p812_p2 = pnand %p811_p0, %p1121_p12 }
 0x365   : > { %p817_p6 = por %p816_p3, %p815_p1 }
 0x366   : > { %p813_p9 = pneg %p812_p2 }
 0x368   : > { %p818_p11 = pnand %p817_p6, %p813_p9 }
 0x36a   : > { %821 = shalt.err (!%p818_p11)
}
 0x36b   : > { %s869_s8 = smov 128   ;;  %s870_s29 = smov 8  }
 0x36c   : > { %715 = dma.vmem_to_hbm [thread:$0]  (%p1121_p12), %s1057_s30, 512, %s1063_s17, %s585_s5, %s869_s8, %s869_s8, %s870_s29  }
 0x36d PF: > { %s614_s9 = sand.u32 1, %s848_s23   ;;  %p1122_p13 = scmp.ne.s32.totalorder %s1118_s11, 0 }
 0x36e   : > { %p1123_p4 = scmp.ge.s32.totalorder %s860_s26, 2  ;;  %s615_s19 = scalar_lea.sflag [#allocation5], %s614_s9 }
 0x370   : > { %p722_p5 = pnand %p1123_p4, %p1122_p13 }
 0x372   : > { %p723_p7 = pneg %p722_p5 }
 0x374   : > { %843 = dma.done.wait (%p723_p7), %s615_s19, 512  }
 0x375   : > { %845 = vsyncadd (%p723_p7), %s615_s19, 4294966784  ;;  %p20_p8 = scmp.ge.s32.totalorder %s934_s28, 4   ;;  %s1124_s23 = smov %s852_s24 }
 0x376   : > { %s1125_s24 = smov %s856_s25  ;;  %s1126_s25 = smov %s946_s7 }
 0x377   : > { %s1127_s26 = smov %s934_s28  ;;  %22 = sbr.rel (!%p20_p8) target bundleno = 7 (0x7), region = 89 }
 0x37c   :  { %620 = vsyncpa [#allocation4], 1 }
 0x37d   :  { %622 = vsyncpa [#allocation4 + $0x1], 1 }
 0x37e   :  { %623 = vsyncpa [#allocation5], 1 }
 0x37f   :  { %625 = vsyncpa [#allocation5 + $0x1], 1 }

</bundles_post_ra>
